<compile_context>
chip_gen: v7x
topology: tpu7x:2x2x1
jax: 0.10.0
libtpu: 0.0.40
codegen_flags: <defaults>
</compile_context>

<pallas_src>
import jax
import jax.numpy as jnp
from jax.experimental import pallas as pl
from jax.experimental.pallas import tpu as pltpu

# Architecture constants (PyTorch module defaults: l_sizes=[(16,8),(8,4),(8,4)], class_op_size=22)
_IN_FEATURES = 16
_COM_WIDTH = 8
_HEAD_WIDTH = 4
_NUM_CLASSES = 22
_REG_COL = _NUM_CLASSES          # column 22 of the fused layer-3 result holds the regressor value
_D = 24                          # padded uniform width (>= max(16+1 bias row, 22+1)); free inside 128-lane vregs
_CARRIER = 8                     # column that carries the constant 1.0 through the hidden layers

# Only force a 2-way grid split (for v7x megacore) when each block keeps >= this many rows,
# so per-step pipeline overhead (~0.35us) stays negligible on single-core chips.
_MEGACORE_SPLIT_MIN = 512


def _cdiv(a, b):
    return -(-a // b)


def _round_up(n, m):
    return _cdiv(n, m) * m


def _fused_kernel(x_ref, w_ref, probs_ref, reg_ref):
    x = x_ref[...]                                   # (tb, 16) raw input, no augmentation
    w0 = w_ref[0]                                    # (24, 24); rows 0..15 = W_com, row 16 = bias row

    # layer 1: common Linear(16->8) + ReLU. Explicit bias add (row 16). The carrier column
    # comes out as exactly 1.0 because w0[:16, CARRIER] == 0 and the bias row has 1.0 there.
    h = jnp.maximum(
        jnp.dot(x, w0[:_IN_FEATURES, :], preferred_element_type=jnp.float32)
        + w0[_IN_FEATURES:_IN_FEATURES + 1, :], 0.0)

    # layer 2: classifier Linear(8->4) and regressor Linear(8->4) side-by-side + ReLU
    # (biases folded via the carrier column).
    h = jnp.maximum(jnp.dot(h, w_ref[1], preferred_element_type=jnp.float32), 0.0)

    # layer 3: block-diagonal Linear(4->22) (+) Linear(4->1), biases folded.
    z = jnp.dot(h, w_ref[2], preferred_element_type=jnp.float32)

    # softmax over the 22 classifier lanes (static slice: stays inside one 128-lane tile,
    # no relayout, no iota/select masking needed).
    zc = z[:, :_NUM_CLASSES]
    m = jnp.max(zc, axis=1, keepdims=True)
    e = jnp.exp(zc - m)
    inv = pl.reciprocal(jnp.sum(e, axis=1, keepdims=True))   # exact (keeps 1e-5 tolerance)
    probs_ref[...] = (e * inv).astype(probs_ref.dtype)
    reg_ref[...] = z[:, _REG_COL:_REG_COL + 1].astype(reg_ref.dtype)


def _choose_batch_tiling(b, max_block_batch):
    """Pick (tile_rows, padded_batch). Large tiles amortize per-step overhead; split >=2
    blocks when big enough so v7x megacore can shard the parallel grid axis."""
    bp8 = _round_up(b, 8)
    n_blocks = _cdiv(bp8, max_block_batch)
    if n_blocks == 1 and bp8 >= 2 * _MEGACORE_SPLIT_MIN:
        n_blocks = 2
    tb = _round_up(_cdiv(bp8, n_blocks), 8)
    bp = _round_up(bp8, tb)
    return tb, bp


def multitask_nn_corr_v2(x, w_packed, *, max_block_batch=2048, vmem_limit_bytes=64 << 20):
    """Fused forward pass.

    Args:
      x: (batch, 16) float32 input.
      w_packed: (3, 24, 24) packed/augmented weight slab from pack_params().
      max_block_batch: rows per grid block. Generation-tunable: ~2048-4096 is safe on
        v7x (64 MiB VMEM/TC); v5e/v6e (128 MiB) can go to 8192 with a matching
        vmem_limit_bytes bump.
      vmem_limit_bytes: scoped-VMEM limit handed to Mosaic (defaults: v5e 16 MiB /
        v6e,v7x 32 MiB are too small for large tiles).
    Returns:
      (classifier_probs (batch, 22), regressor_out (batch, 1)), both float32.
    """
    b, f = x.shape
    assert f == _IN_FEATURES, f"expected {_IN_FEATURES} input features, got {f}"
    dtype = jnp.float32
    x = x.astype(dtype)
    # TODO(synk): optional bf16 cast of x/w at the HBM boundary would halve input traffic
    # but breaks the 1e-5 tolerance of the reference check, so it is not applied here.

    tb, bp = _choose_batch_tiling(b, max_block_batch)
    x_in = x if bp == b else jnp.pad(x, ((0, bp - b), (0, 0)))
    grid = (bp // tb,)

    flops = 2 * bp * (_IN_FEATURES * _COM_WIDTH
                      + _COM_WIDTH * 2 * _HEAD_WIDTH
                      + 2 * _HEAD_WIDTH * (_NUM_CLASSES + 1))
    bytes_accessed = 4 * (bp * _IN_FEATURES + w_packed.size + bp * (_NUM_CLASSES + 1))

    probs, reg = pl.pallas_call(
        _fused_kernel,
        out_shape=(jax.ShapeDtypeStruct((bp, _NUM_CLASSES), dtype),
                   jax.ShapeDtypeStruct((bp, 1), dtype)),
        grid=grid,
        in_specs=[
            pl.BlockSpec((tb, _IN_FEATURES), lambda i: (i, 0)),
            pl.BlockSpec((3, _D, _D), lambda i: (0, 0, 0)),
        ],
        out_specs=(
            pl.BlockSpec((tb, _NUM_CLASSES), lambda i: (i, 0)),
            pl.BlockSpec((tb, 1), lambda i: (i, 0)),
        ),
        compiler_params=pltpu.CompilerParams(
            dimension_semantics=("parallel",),
            vmem_limit_bytes=vmem_limit_bytes),
        cost_estimate=pl.CostEstimate(
            flops=flops,
            transcendentals=bp * _NUM_CLASSES,
            bytes_accessed=bytes_accessed),
    )(x_in, w_packed)

    if bp != b:
        probs, reg = probs[:b], reg[:b]
    return probs, reg


def init_params(key):
    """PyTorch-style nn.Linear init. Weights stored transposed: (in, out)."""
    shapes = {
        "w_com": (_IN_FEATURES, _COM_WIDTH), "b_com": (_COM_WIDTH,),
        "w_c1": (_COM_WIDTH, _HEAD_WIDTH),   "b_c1": (_HEAD_WIDTH,),
        "w_c2": (_HEAD_WIDTH, _NUM_CLASSES), "b_c2": (_NUM_CLASSES,),
        "w_r1": (_COM_WIDTH, _HEAD_WIDTH),   "b_r1": (_HEAD_WIDTH,),
        "w_r2": (_HEAD_WIDTH, 1),            "b_r2": (1,),
    }
    keys = jax.random.split(key, len(shapes))
    params = {}
    for (name, shape), k in zip(shapes.items(), keys):
        fan_in = shapes["w" + name[1:]][0]  # bias uses its layer's fan_in
        bound = 1.0 / jnp.sqrt(jnp.float32(fan_in))
        params[name] = jax.random.uniform(
            k, shape, minval=-bound, maxval=bound, dtype=jnp.float32)
    return params


def pack_params(params):
    """Pack all 10 weight/bias tensors into one (3, 24, 24) augmented slab."""
    w = jnp.zeros((3, _D, _D), jnp.float32)
    # layer 1: common Linear(16,8); row 16 is the bias row; col 8 carries 1.0 forward.
    w = w.at[0, :_IN_FEATURES, :_COM_WIDTH].set(params["w_com"])
    w = w.at[0, _IN_FEATURES, :_COM_WIDTH].set(params["b_com"])
    w = w.at[0, _IN_FEATURES, _CARRIER].set(1.0)
    # layer 2: classifier (8->4) in cols 0..3, regressor (8->4) in cols 4..7; row 8 = biases + carrier.
    w = w.at[1, :_COM_WIDTH, :_HEAD_WIDTH].set(params["w_c1"])
    w = w.at[1, :_COM_WIDTH, _HEAD_WIDTH:2 * _HEAD_WIDTH].set(params["w_r1"])
    w = w.at[1, _CARRIER, :_HEAD_WIDTH].set(params["b_c1"])
    w = w.at[1, _CARRIER, _HEAD_WIDTH:2 * _HEAD_WIDTH].set(params["b_r1"])
    w = w.at[1, _CARRIER, _CARRIER].set(1.0)
    # layer 3: block-diagonal classifier (4->22) and regressor (4->1); row 8 = biases.
    w = w.at[2, :_HEAD_WIDTH, :_NUM_CLASSES].set(params["w_c2"])
    w = w.at[2, _HEAD_WIDTH:2 * _HEAD_WIDTH, _REG_COL].set(params["w_r2"][:, 0])
    w = w.at[2, _CARRIER, :_NUM_CLASSES].set(params["b_c2"])
    w = w.at[2, _CARRIER, _REG_COL].set(params["b_r2"][0])
    # The in-kernel layer-1 bias add only produces a 1.0 carrier column because the
    # weight rows of layer 0 leave that column untouched -- keep it that way.
    assert float(jnp.sum(jnp.abs(w[0, :_IN_FEATURES, _CARRIER]))) == 0.0
    return w


def reference_forward(x, params):
    """Plain-JAX eval-mode reference of MultiTaskNNCorr_v2.forward."""
    h = jnp.maximum(x @ params["w_com"] + params["b_com"], 0.0)   # Dropout -> identity (eval)
    c = jnp.maximum(h @ params["w_c1"] + params["b_c1"], 0.0)
    probs = jax.nn.softmax(c @ params["w_c2"] + params["b_c2"], axis=1)
    r = jnp.maximum(h @ params["w_r1"] + params["b_r1"], 0.0)
    reg = r @ params["w_r2"] + params["b_r2"]
    return probs, reg


if __name__ == "__main__":
    key = jax.random.PRNGKey(0)
    k_x, k_p = jax.random.split(key)

    params = init_params(k_p)
    w_packed = pack_params(params)

    # Small-batch check (single block, no padding).
    batch = 8
    x = jax.random.normal(k_x, (batch, _IN_FEATURES), dtype=jnp.float32)
    c_out, r_out = multitask_nn_corr_v2(x, w_packed)
    jax.block_until_ready((c_out, r_out))

    c_ref, r_ref = reference_forward(x, params)
    assert c_out.shape == (batch, _NUM_CLASSES) and r_out.shape == (batch, 1)
    assert jnp.allclose(c_out, c_ref, atol=1e-5, rtol=1e-5)
    assert jnp.allclose(r_out, r_ref, atol=1e-5, rtol=1e-5)
    # classifier rows are softmax -> should each sum to 1
    assert jnp.allclose(jnp.sum(c_out, axis=1), jnp.ones((batch,)), atol=1e-5)

    # Multi-block + padded-batch path (exercises grid > 1, row padding, megacore sharding).
    batch2 = 200
    x2 = jax.random.normal(jax.random.PRNGKey(1), (batch2, _IN_FEATURES), dtype=jnp.float32)
    c2, r2 = multitask_nn_corr_v2(x2, w_packed, max_block_batch=64)
    jax.block_until_ready((c2, r2))
    c2_ref, r2_ref = reference_forward(x2, params)
    assert c2.shape == (batch2, _NUM_CLASSES) and r2.shape == (batch2, 1)
    assert jnp.allclose(c2, c2_ref, atol=1e-5, rtol=1e-5)
    assert jnp.allclose(r2, r2_ref, atol=1e-5, rtol=1e-5)

    print("KERNEL_OK")
</pallas_src>

<mosaic_0001>
module attributes {stable_mosaic.version = 11 : i64} {
  func.func @_fused_kernel(%arg0: i32, %arg1: memref<8x16xf32, #tpu.memory_space<vmem>>, %arg2: memref<3x24x24xf32, #tpu.memory_space<vmem>>, %arg3: memref<8x22xf32, #tpu.memory_space<vmem>>, %arg4: memref<8x1xf32, #tpu.memory_space<vmem>>) attributes {dimension_semantics = [#tpu.dimension_semantics<parallel>], iteration_bounds = array<i64: 1>, scalar_prefetch = 0 : i64, scratch_operands = 0 : i64, tpu.core_type = #tpu.core_type<tc>, window_params = [{transform_indices = @transform_0, window_bounds = array<i64: 8, 16>}, {pipeline_mode = #tpu.pipeline_mode<synchronous>, transform_indices = @transform_1, window_bounds = array<i64: 3, 24, 24>}, {transform_indices = @transform_2, window_bounds = array<i64: 8, 22>}, {transform_indices = @transform_3, window_bounds = array<i64: 8, 1>}]} {
    %c0 = arith.constant 0 : index
    %c0_0 = arith.constant 0 : index
    %0 = vector.load %arg1[%c0, %c0_0] : memref<8x16xf32, #tpu.memory_space<vmem>>, vector<8x16xf32>
    %c0_1 = arith.constant 0 : index
    %c0_2 = arith.constant 0 : index
    %c0_3 = arith.constant 0 : index
    %1 = vector.load %arg2[%c0_1, %c0_2, %c0_3] : memref<3x24x24xf32, #tpu.memory_space<vmem>>, vector<1x24x24xf32>
    %2 = vector.shape_cast %1 : vector<1x24x24xf32> to vector<24x24xf32>
    %3 = vector.extract_strided_slice %2 {offsets = [0, 0], sizes = [16, 24], strides = [1, 1]} : vector<24x24xf32> to vector<16x24xf32>
    %cst = arith.constant dense<0.000000e+00> : vector<8x24xf32>
    %4 = tpu.matmul %0, %3, %cst {dimension_numbers = #tpu.dot_dimension_numbers<[1], [0], [0], [1], [0, 0, 1, 1], [], []>} : vector<8x16xf32>, vector<16x24xf32>, vector<8x24xf32> -> vector<8x24xf32>
    %5 = vector.extract_strided_slice %2 {offsets = [16, 0], sizes = [1, 24], strides = [1, 1]} : vector<24x24xf32> to vector<1x24xf32>
    %6 = vector.broadcast %5 : vector<1x24xf32> to vector<8x24xf32>
    %7 = arith.addf %4, %6 : vector<8x24xf32>
    %cst_4 = arith.constant 0.000000e+00 : f32
    %8 = vector.broadcast %cst_4 : f32 to vector<8x24xf32>
    %9 = arith.maximumf %7, %8 : vector<8x24xf32>
    %c1 = arith.constant 1 : index
    %c0_5 = arith.constant 0 : index
    %c0_6 = arith.constant 0 : index
    %10 = vector.load %arg2[%c1, %c0_5, %c0_6] : memref<3x24x24xf32, #tpu.memory_space<vmem>>, vector<1x24x24xf32>
    %11 = vector.shape_cast %10 : vector<1x24x24xf32> to vector<24x24xf32>
    %cst_7 = arith.constant dense<0.000000e+00> : vector<8x24xf32>
    %12 = tpu.matmul %9, %11, %cst_7 {dimension_numbers = #tpu.dot_dimension_numbers<[1], [0], [0], [1], [0, 0, 1, 1], [], []>} : vector<8x24xf32>, vector<24x24xf32>, vector<8x24xf32> -> vector<8x24xf32>
    %cst_8 = arith.constant 0.000000e+00 : f32
    %13 = vector.broadcast %cst_8 : f32 to vector<8x24xf32>
    %14 = arith.maximumf %12, %13 : vector<8x24xf32>
    %c2 = arith.constant 2 : index
    %c0_9 = arith.constant 0 : index
    %c0_10 = arith.constant 0 : index
    %15 = vector.load %arg2[%c2, %c0_9, %c0_10] : memref<3x24x24xf32, #tpu.memory_space<vmem>>, vector<1x24x24xf32>
    %16 = vector.shape_cast %15 : vector<1x24x24xf32> to vector<24x24xf32>
    %cst_11 = arith.constant dense<0.000000e+00> : vector<8x24xf32>
    %17 = tpu.matmul %14, %16, %cst_11 {dimension_numbers = #tpu.dot_dimension_numbers<[1], [0], [0], [1], [0, 0, 1, 1], [], []>} : vector<8x24xf32>, vector<24x24xf32>, vector<8x24xf32> -> vector<8x24xf32>
    %18 = vector.extract_strided_slice %17 {offsets = [0, 0], sizes = [8, 22], strides = [1, 1]} : vector<8x24xf32> to vector<8x22xf32>
    %cst_12 = arith.constant dense<0xFF800000> : vector<8xf32>
    %19 = vector.multi_reduction <maximumf>, %18, %cst_12 [1] : vector<8x22xf32> to vector<8xf32>
    %20 = vector.shape_cast %19 : vector<8xf32> to vector<8x1xf32>
    %21 = vector.broadcast %20 : vector<8x1xf32> to vector<8x22xf32>
    %22 = arith.subf %18, %21 : vector<8x22xf32>
    %23 = math.exp %22 : vector<8x22xf32>
    %cst_13 = arith.constant dense<0.000000e+00> : vector<8xf32>
    %24 = vector.multi_reduction <add>, %23, %cst_13 [1] : vector<8x22xf32> to vector<8xf32>
    %25 = vector.shape_cast %24 : vector<8xf32> to vector<8x1xf32>
    %26 = tpu.reciprocal %25 : vector<8x1xf32> -> vector<8x1xf32>
    %27 = vector.broadcast %26 : vector<8x1xf32> to vector<8x22xf32>
    %28 = arith.mulf %23, %27 : vector<8x22xf32>
    %c0_14 = arith.constant 0 : index
    %c0_15 = arith.constant 0 : index
    %29 = vector.load %arg3[%c0_14, %c0_15] : memref<8x22xf32, #tpu.memory_space<vmem>>, vector<8x22xf32>
    tpu.vector_store %arg3[%c0_14, %c0_15], %28 {strides = array<i32>} : memref<8x22xf32, #tpu.memory_space<vmem>>, vector<8x22xf32>,
    %30 = vector.extract_strided_slice %17 {offsets = [0, 22], sizes = [8, 1], strides = [1, 1]} : vector<8x24xf32> to vector<8x1xf32>
    %c0_16 = arith.constant 0 : index
    %c0_17 = arith.constant 0 : index
    %31 = vector.load %arg4[%c0_16, %c0_17] : memref<8x1xf32, #tpu.memory_space<vmem>>, vector<8x1xf32>
    tpu.vector_store %arg4[%c0_16, %c0_17], %30 {strides = array<i32>} : memref<8x1xf32, #tpu.memory_space<vmem>>, vector<8x1xf32>,
    return
  }
  func.func @transform_0(%arg0: i32) -> (i32, i32) {
    %c0_i32 = arith.constant 0 : i32
    %c0_i32_0 = arith.constant 0 : i32
    return %arg0, %c0_i32 : i32, i32
  }
  func.func @transform_1(%arg0: i32) -> (i32, i32, i32) {
    %c0_i32 = arith.constant 0 : i32
    %c0_i32_0 = arith.constant 0 : i32
    %c0_i32_1 = arith.constant 0 : i32
    %c0_i32_2 = arith.constant 0 : i32
    return %c0_i32, %c0_i32_0, %c0_i32_1 : i32, i32, i32
  }
  func.func @transform_2(%arg0: i32) -> (i32, i32) {
    %c0_i32 = arith.constant 0 : i32
    %c0_i32_0 = arith.constant 0 : i32
    return %arg0, %c0_i32 : i32, i32
  }
  func.func @transform_3(%arg0: i32) -> (i32, i32) {
    %c0_i32 = arith.constant 0 : i32
    %c0_i32_0 = arith.constant 0 : i32
    return %arg0, %c0_i32 : i32, i32
  }
}

</mosaic_0001>

<bundles_post_ra>
// kernel: tpu_custom_call.1
= control target key start
LH: loop header
LB: loop body
LE: loop exit
PB: predicated region body
PF: predicated region fallthrough
CT: control target
= control target key end

     0   :  { %9 = vsyncpa [#allocation3], 0  ;;  %s575_s0 = inlined_call_operand.hbm [shape: f32[8,16], index: 0, kind: input, shape index: {}]   ;;  %s576_s1 = inlined_call_operand.hbm [shape: f32[3,24,24], index: 1, kind: input, shape index: {}]   ;;  %s577_s2 = inlined_call_operand.hbm [shape: f32[8,22], index: 2, kind: output, shape index: {0}]   ;;  %s578_s3 = inlined_call_operand.hbm [shape: f32[8,1], index: 3, kind: output, shape index: {1}]  }
   0x1   :  { %10 = vsyncpa [#allocation6], 0 }
   0x2   :  { %11 = vsyncpa [#allocation4], 0 }
   0x3   :  { %12 = vsyncpa [#allocation9], 0  ;;  %s487_s12 = smov [#allocation2]   ;;  %s488_s14 = smov [#allocation5]  }
   0x4   :  { %s19_s13 = sshll.u32 %s487_s12, 4  ;;  %s28_s15 = sshll.u32 %s488_s14, 4  ;;  %s20_s13 = int_to_ptr.vmem [resolvable:$true] %s19_s13  ;;  %s517_s15 = int_to_ptr.vmem [resolvable:$true] %s28_s15 }
   0x5   :  { %s391_s18 = scalar_lea.hbm %s575_s0, 128 }
   0x6   :  { %p392_p0 = scmp.ne.s32.totalorder %s575_s0, %s391_s18  ;;  %p395_p1 = scmp.lt.u32.totalorder %s391_s18, %s575_s0 }
   0x8   :  { %p397_p2 = pnand %p395_p1, %p392_p0 }
   0xa   :  { %400 = shalt.err (!%p397_p2)
}
   0xb   :  { %s401_s23 = scalar_lea.vmem %s20_s13, 128  ;;  %p406_p4 = scmp.lt.s32.totalorder %s20_s13, %s20_s13 }
   0xc   :  { %p402_p3 = scmp.ne.s32.totalorder %s20_s13, %s401_s23  ;;  %p407_p5 = scmp.lt.s32.totalorder %s401_s23, %s401_s23 }
   0xe   :  { %p408_p6 = por %p407_p5, %p406_p4 }
  0x10   :  { %p409_p7 = pnand %p408_p6, %p402_p3 }
  0x12   :  { %412 = shalt.err (!%p409_p7)
}
  0x13   :  { %22 = dma.hbm_to_vmem [thread:$0]  %s575_s0, 128, %s20_s13, [#allocation3]  }
  0x14   :  { %s413_s28 = scalar_lea.hbm %s576_s1, 1152 }
  0x15   :  { %p414_p8 = scmp.ne.s32.totalorder %s576_s1, %s413_s28  ;;  %p417_p9 = scmp.lt.u32.totalorder %s413_s28, %s576_s1 }
  0x17   :  { %p419_p10 = pnand %p417_p9, %p414_p8 }
  0x19   :  { %422 = shalt.err (!%p419_p10)
}
  0x1a   :  { %s423_s6 = scalar_lea.vmem %s517_s15, 1152  ;;  %p428_p12 = scmp.lt.s32.totalorder %s517_s15, %s517_s15 }
  0x1b   :  { %p424_p11 = scmp.ne.s32.totalorder %s517_s15, %s423_s6  ;;  %p429_p13 = scmp.lt.s32.totalorder %s423_s6, %s423_s6 }
  0x1d   :  { %p430_p0 = por %p429_p13, %p428_p12 }
  0x1f   :  { %p431_p1 = pnand %p430_p0, %p424_p11 }
  0x21   :  { %434 = shalt.err (!%p431_p1)
}
  0x22   :  { %s489_s0 = smov 128   ;;  %s490_s7 = smov 8  }
  0x23   :  { %34 = dma.hbm_to_vmem [thread:$0]  %s576_s1, 1152, %s517_s15, [#allocation6], %s489_s0, %s489_s0, %s490_s7  }
  0x24   :  { %479 = dma.done.wait [#allocation3], 128  }
  0x25   :  { %480 = vsyncadd [#allocation3], 4294967168 }
  0x26   :  { %481 = dma.done.wait [#allocation6], 1152  }
  0x27   :  { %482 = vsyncadd [#allocation6], 4294966144  ;;  %v491_v0 = vmov 0.0|0.0   ;;  %vm492_vm0 = vmmov 0   ;;  %v493_v1 = vmov 0.0   ;;  %v42_v2 = vld [vmem:[#allocation5] sm:$0xff]  ;;  %v45_v13 = vlaneseq }
  0x28   :  { %368 = vmatprep.subr.bf16.mxu0 %v491_v0  ;;  %347 = vmatprep.mubr.msk.f32.mxu0 %vm492_vm0, %v493_v1  ;;  %v43_v3 = vld [vmem:[#allocation5 + $0x8] sm:$0xff]  ;;  %v41_v5 = vld [vmem:[#allocation2] sm:$0xff]  ;;  %vm49_vm1 = vcmask 130048   ;;  %v126_v7 = vld [vmem:[#allocation5 + $0x20] sm:$0xff]  ;;  %vm128_vm2 = vcmask 195584   ;;  %vm280_vm3 = vcmask 179200  }
  0x29   :  { %371 = vmatprep.subr.bf16.mxu1 %v491_v0  ;;  %356 = vmatprep.mubr.msk.f32.mxu1 %vm492_vm0, %v493_v1  ;;  %v369_v4 = vpack.c.bf16 %v43_v3, %v42_v2  ;;  %v125_v6 = vld [vmem:[#allocation5 + $0x18] sm:$0xff]  ;;  %v127_v9 = vld [vmem:[#allocation5 + $0x28] sm:$0xff]  ;;  %v204_v10 = vld [vmem:[#allocation5 + $0x30] sm:$0xff]  ;;  %v46_v14 = vshrl.u32 %v45_v13, 7  ;;  %s494_s1 = smov 106   ;;  %vm297_vm4 = vcmask 7168  }
  0x2a   :  { %v372_v8 = vpack.c.bf16 %v126_v7, %v125_v6  ;;  %v205_v11 = vld [vmem:[#allocation5 + $0x38] sm:$0xff]  ;;  %v44_v16 = vld [vmem:[#allocation5 + $0x10] sm:$0xff]  ;;  %v206_v22 = vld [vmem:[#allocation5 + $0x40] sm:$0xff]  ;;  %s495_s10 = smov [#allocation8]  }
  0x2b   :  { %370 = vmatpush3.bf16.msra.mxu0 %v369_v4  ;;  %v375_v12 = vpack.c.bf16 %v205_v11, %v204_v10  ;;  %v47_v15 = vsub.s32 0, %v46_v14  ;;  %s315_s11 = sshll.u32 %s495_s10, 4  ;;  %s316_s11 = int_to_ptr.vmem [resolvable:$true] %s315_s11 }
  0x2c   :  { %374 = vmatprep.subr.bf16.mxu0 %v491_v0  ;;  %373 = vmatpush3.bf16.msra.mxu1 %v372_v8  ;;  %s435_s12 = scalar_lea.vmem %s316_s11, 128  ;;  %p440_p3 = scmp.lt.s32.totalorder %s316_s11, %s316_s11 }
  0x2d   :  { %354 = vmatprep.subr.mxu1 %v493_v1  ;;  %v48_v17 = vrot.slane %v44_v16, %v47_v15  ;;  %p436_p2 = scmp.ne.s32.totalorder %s316_s11, %s435_s12  ;;  %p441_p4 = scmp.lt.s32.totalorder %s435_s12, %s435_s12 }
  0x2e   :  { %348 = vmatmul.mubr.msk.f32.vlgmr.msra.gmra.mrb[0].mxu0 %vm49_vm1, %v41_v5 }
  0x2f   :  { %365 = vmatprep.mubr.msk.f32.mxu0 %vm492_vm0, %v493_v1  ;;  %376 = vmatpush3.bf16.msra.mxu0 %v375_v12  ;;  %p442_p5 = por %p441_p4, %p440_p3 }
  0x30   :  { %355 = vmatpush3.msra.mxu1 %v127_v9  ;;  %363 = vmatprep.subr.mxu0 %v493_v1 }
  0x31   :  { %p443_p6 = pnand %p442_p5, %p436_p2 }
  0x33   :  { %364 = vmatpush3.msra.mxu0 %v206_v22 }
 0x101   :  { %v119_v18 = vpop.f32.mrb[0].mxu0 }
 0x102   :  { %v120_v19 = vadd.f32 %v119_v18, %v48_v17  ;;  %v349_v20 = vpop.f32.mrb[1].mxu0 }
 0x104   :  { %v123_v21 = vmax.f32 %v120_v19, 0.0 }
 0x106   :  { %357 = vmatmul.mubr.msk.f32.vlgmr.msra.gmra.mrb[0].mxu1 %vm128_vm2, %v123_v21 }
 0x1d9   :  { %v198_v23 = vpop.f32.mrb[0].mxu1 }
 0x1da   :  { %v202_v24 = vmax.f32 %v198_v23, 0.0  ;;  %v358_v25 = vpop.f32.mrb[1].mxu1 }
 0x1dc   :  { %366 = vmatmul.mubr.msk.f32.vlgmr.msra.gmra.mrb[2].mxu0 %vm128_vm2, %v202_v24 }
 0x2af   :  { %v276_v26 = vpop.f32.mrb[2].mxu0 }
 0x2b0   :  { %294 = vrot.lane.b32.xlu1 %v276_v26, %s494_s1  ;;  %v367_v27 = vpop.f32.mrb[3].mxu0  ;;  %v281_v28 = vsel %vm280_vm3, %v276_v26, -inf }
 0x2b1   :  { %282 = vmax.xlane.f32.xlu0 %v281_v28 }
 0x322   :  { %v295_v29 = vpop.permute.xlu1 %294 }
 0x323   :  { %298 = vst.msk [vmem:[#allocation8] sm:$0xff] %vm297_vm4, %v295_v29 }
 0x33e   :  { %v283_v30 = vpop.xlane.xlu0 %282 }
 0x33f   :  { %v284_v31 = vsub.f32 %v276_v26, %v283_v30 }
 0x341   :  { %v285_v32 = vmul.f32 1.442695, %v284_v31 }
 0x343   :  { %387 = vpow2.f32 %v285_v32 }
 0x34d   :  { %v388_v33 = vpop.eup %387 }
 0x34e   :  { %v287_v34 = vsel %vm280_vm3, %v388_v33, 0.0 }
 0x34f   :  { %288 = vadd.xlane.f32.xlu0 %v287_v34 }
 0x350   :  { %446 = shalt.err (!%p443_p6)
}
 0x351   :  { %s447_s15 = scalar_lea.hbm %s578_s3, 128 }
 0x352   :  { %p448_p7 = scmp.ne.s32.totalorder %s578_s3, %s447_s15  ;;  %p451_p8 = scmp.lt.u32.totalorder %s447_s15, %s578_s3 }
 0x354   :  { %p453_p9 = pnand %p451_p8, %p448_p7 }
 0x356   :  { %456 = shalt.err (!%p453_p9)
}
 0x357   :  { %318 = dma.vmem_to_hbm [thread:$0]  %s316_s11, 128, %s578_s3, [#allocation9]  }
 0x358   :  { %s496_s22 = smov [#allocation7]  }
 0x359   :  { %s305_s23 = sshll.u32 %s496_s22, 4  ;;  %s306_s23 = int_to_ptr.vmem [resolvable:$true] %s305_s23 }
 0x35a   :  { %s457_s24 = scalar_lea.vmem %s306_s23, 128  ;;  %p462_p11 = scmp.lt.s32.totalorder %s306_s23, %s306_s23 }
 0x35b   :  { %p458_p10 = scmp.ne.s32.totalorder %s306_s23, %s457_s24  ;;  %p463_p12 = scmp.lt.s32.totalorder %s457_s24, %s457_s24 }
 0x35d   :  { %p464_p13 = por %p463_p12, %p462_p11 }
 0x35f   :  { %p465_p0 = pnand %p464_p13, %p458_p10 }
 0x3dc   :  { %v289_v35 = vpop.xlane.xlu0 %288 }
 0x3dd   :  { %389 = vrcp.f32 %v289_v35 }
 0x3e7   :  { %v390_v36 = vpop.eup %389 }
 0x3e8   :  { %v291_v37 = vmul.f32 %v390_v36, %v388_v33 }
 0x3ea   :  { %292 = vst.msk [vmem:[#allocation7] sm:$0xff] %vm280_vm3, %v291_v37 }
 0x3eb   :  { %468 = shalt.err (!%p465_p0)
}
 0x3ec   :  { %s469_s3 = scalar_lea.hbm %s577_s2, 128 }
 0x3ed   :  { %p470_p1 = scmp.ne.s32.totalorder %s577_s2, %s469_s3  ;;  %p473_p2 = scmp.lt.u32.totalorder %s469_s3, %s577_s2 }
 0x3ef   :  { %p475_p3 = pnand %p473_p2, %p470_p1 }
 0x3f1   :  { %478 = shalt.err (!%p475_p3)
}
 0x3f2   :  { %308 = dma.vmem_to_hbm [thread:$0]  %s306_s23, 128, %s577_s2, [#allocation4]  }
 0x3f3   :  { %483 = dma.done.wait [#allocation4], 128  }
 0x3f4   :  { %484 = vsyncadd [#allocation4], 4294967168 }
 0x3f5   :  { %485 = dma.done.wait [#allocation9], 128  }
 0x3f6   :  { %486 = vsyncadd [#allocation9], 4294967168 }
 0x3f7   :  { %325 = vsyncpa [#allocation3], 1 }
 0x3f8   :  { %326 = vsyncpa [#allocation6], 1 }
 0x3f9   :  { %327 = vsyncpa [#allocation4], 1 }
 0x3fa   :  { %328 = vsyncpa [#allocation9], 1 }

</bundles_post_ra>
